<compile_context>
chip_gen: v7x
topology: tpu7x:2x2x1
jax: 0.10.0
libtpu: 0.0.40
codegen_flags: <defaults>
</compile_context>

<pallas_src>
import jax
import jax.numpy as jnp
from jax.experimental import pallas as pl
from jax.experimental.pallas import tpu as pltpu


def _round_up(x, m):
    return -(-x // m) * m


def _pick_rc(ne):
    """Factor the (lane-padded) flattened length into (R rows, C lanes).

    C is a multiple of 128 that divides ne_pad exactly, so the reshape to (V, R, C)
    is free on contiguous data and every tile is lane-dense.
    """
    ne_pad = _round_up(ne, 128)
    for c in (2048, 1024, 512, 256, 128):
        if ne_pad % c == 0:
            return ne_pad // c, c, ne_pad
    raise AssertionError("unreachable: ne_pad is a multiple of 128")


def _pick_tr(n_view, R, C, in_itemsize):
    """Rows-per-tile: big enough to amortize ~0.35us/step, small enough for VMEM,
    and (when possible) >= 2 grid steps so the parallel grid spans both v7x TCs."""
    vmem_budget = 12 * 1024 * 1024            # double-buffered in + out per step
    max_out_elems = vmem_budget // (2 * (n_view * in_itemsize + 4))
    max_out_elems = min(max_out_elems, 256 * 1024)   # 256K f32 out elems per step
    tr = max(8, (max_out_elems // C) // 8 * 8)
    if R < 8:
        return R                               # block dim == full dim (allowed)
    if R > 8:
        tr = min(tr, _round_up(pl.cdiv(R, 2), 8))    # >= 2 grid steps
    return min(tr, _round_up(R, 8))


def _make_fusion_kernel(n_view):
    def kernel(probs_ref, items_ref, out_ref):
        # probs_ref: SMEM (1, V) f32 softmax probabilities for this segment
        # items_ref: VMEM (V, TR, C) sublane-/lane-dense tile of view embeddings
        # out_ref:   VMEM (TR, C) fused tile
        w = [probs_ref[0, j] for j in range(n_view)]          # hoisted scalar reads
        acc = items_ref[0].astype(jnp.float32) * w[0]
        for j in range(1, n_view):                            # V tiny -> unrolled VPU sum
            acc = acc + items_ref[j].astype(jnp.float32) * w[j]
        out_ref[...] = acc
    return kernel


def _fuse_one_segment(items3d, probs_row):
    """Weighted sum over the view axis for one segment (users or products)."""
    n_view, n_items, emb = items3d.shape
    ne = n_items * emb
    R, C, ne_pad = _pick_rc(ne)

    x2d = items3d.reshape(n_view, ne)                         # free (contiguous)
    if ne_pad > ne:
        # Minimal lane pad (< 128 elems per view row); zeros contribute 0 to the sum.
        x2d = jnp.pad(x2d, ((0, 0), (0, ne_pad - ne)))
    x3d = x2d.reshape(n_view, R, C)                           # free (contiguous)

    in_itemsize = items3d.dtype.itemsize
    tr = _pick_tr(n_view, R, C, in_itemsize)
    num_tiles = pl.cdiv(R, tr)

    # Double-buffered footprint + headroom, kept within every generation's budget.
    step_bytes = 2 * tr * C * (n_view * in_itemsize + 4)
    vmem_limit = min(max(int(step_bytes * 1.5), 16 * 1024 * 1024), 32 * 1024 * 1024)

    cost = pl.CostEstimate(
        flops=2 * n_view * ne,
        transcendentals=0,
        bytes_accessed=n_view * ne * in_itemsize + ne * 4,
    )

    out = pl.pallas_call(
        _make_fusion_kernel(n_view),
        out_shape=jax.ShapeDtypeStruct((R, C), jnp.float32),
        grid=(num_tiles,),
        in_specs=[
            pl.BlockSpec(memory_space=pltpu.MemorySpace.SMEM),   # (1, V) probs
            pl.BlockSpec((n_view, tr, C), lambda i: (0, i, 0)),  # streamed items
        ],
        out_specs=pl.BlockSpec((tr, C), lambda i: (i, 0)),
        compiler_params=pltpu.CompilerParams(
            dimension_semantics=("parallel",),
            vmem_limit_bytes=vmem_limit,
        ),
        cost_estimate=cost,
    )(probs_row, x3d)

    out_flat = out.reshape(ne_pad)
    if ne_pad > ne:
        out_flat = out_flat[:ne]
    return out_flat.reshape(n_items, emb)


def embedding_fusion_forward(view_items, view_weight):
    """Pallas implementation of EmbeddingFusionLayer.forward."""
    view_users, view_products = view_items[0], view_items[1]
    user_w, product_w = view_weight[0], view_weight[1]

    assert view_users.shape[0] == view_products.shape[0], \
        "both item tensors must share the view axis"

    # softmax(dim=1) then row 0  ==  softmax of row 0 alone (softmax is per-row).
    probs_u = jax.nn.softmax(user_w.astype(jnp.float32), axis=1)[0:1]      # (1, V)
    probs_p = jax.nn.softmax(product_w.astype(jnp.float32), axis=1)[0:1]   # (1, V)

    users = _fuse_one_segment(view_users, probs_u)
    products = _fuse_one_segment(view_products, probs_p)
    return users, products


def embedding_fusion_ref(view_items, view_weight):
    """Pure-JAX reference for correctness checking."""
    view_users, view_products = view_items[0], view_items[1]
    uw = jax.nn.softmax(view_weight[0].astype(jnp.float32), axis=1)[0]
    pw = jax.nn.softmax(view_weight[1].astype(jnp.float32), axis=1)[0]
    users = jnp.einsum("j,jne->ne", uw, view_users.astype(jnp.float32))
    products = jnp.einsum("j,jne->ne", pw, view_products.astype(jnp.float32))
    return users, products


def _run_and_check(key, n_view, n_user, n_product, emb):
    k1, k2, k3, k4 = jax.random.split(key, 4)
    view_users = jax.random.normal(k1, (n_view, n_user, emb), dtype=jnp.float32)
    view_products = jax.random.normal(k2, (n_view, n_product, emb), dtype=jnp.float32)
    user_view_weight = jax.random.normal(k3, (1, n_view), dtype=jnp.float32)
    product_view_weight = jax.random.normal(k4, (1, n_view), dtype=jnp.float32)

    view_items = (view_users, view_products)
    view_weight = (user_view_weight, product_view_weight)

    users, products = embedding_fusion_forward(view_items, view_weight)
    jax.block_until_ready((users, products))

    users_ref, products_ref = embedding_fusion_ref(view_items, view_weight)
    assert users.shape == (n_user, emb) and users.dtype == jnp.float32
    assert products.shape == (n_product, emb) and products.dtype == jnp.float32
    assert jnp.allclose(users, users_ref, atol=1e-5, rtol=1e-5)
    assert jnp.allclose(products, products_ref, atol=1e-5, rtol=1e-5)


if __name__ == "__main__":
    key = jax.random.PRNGKey(0)
    k_a, k_b = jax.random.split(key, 2)

    # Lane-aligned small shapes (as in the module's typical use).
    _run_and_check(k_a, n_view=3, n_user=8, n_product=16, emb=32)
    # Ragged shapes (flattened size not a multiple of 128) exercise the lane-pad path.
    _run_and_check(k_b, n_view=3, n_user=7, n_product=9, emb=20)

    print("KERNEL_OK")
</pallas_src>

<mosaic_0001>
module attributes {stable_mosaic.version = 11 : i64} {
  func.func @kernel(%arg0: i32, %arg1: memref<1x3xf32, #tpu.memory_space<smem>>, %arg2: memref<3x1x256xf32, #tpu.memory_space<vmem>>, %arg3: memref<1x256xf32, #tpu.memory_space<vmem>>) attributes {dimension_semantics = [#tpu.dimension_semantics<parallel>], iteration_bounds = array<i64: 1>, scalar_prefetch = 0 : i64, scratch_operands = 0 : i64, tpu.core_type = #tpu.core_type<tc>, window_params = [{transform_indices = @transform_0, window_bounds = array<i64: 1, 3>}, {transform_indices = @transform_1, window_bounds = array<i64: 3, 1, 256>}, {transform_indices = @transform_2, window_bounds = array<i64: 1, 256>}]} {
    %c0 = arith.constant 0 : index
    %c0_0 = arith.constant 0 : index
    %0 = memref.load %arg1[%c0, %c0_0] : memref<1x3xf32, #tpu.memory_space<smem>>
    %c0_1 = arith.constant 0 : index
    %c1 = arith.constant 1 : index
    %1 = memref.load %arg1[%c0_1, %c1] : memref<1x3xf32, #tpu.memory_space<smem>>
    %c0_2 = arith.constant 0 : index
    %c2 = arith.constant 2 : index
    %2 = memref.load %arg1[%c0_2, %c2] : memref<1x3xf32, #tpu.memory_space<smem>>
    %c0_3 = arith.constant 0 : index
    %c0_4 = arith.constant 0 : index
    %c0_5 = arith.constant 0 : index
    %3 = vector.load %arg2[%c0_3, %c0_4, %c0_5] : memref<3x1x256xf32, #tpu.memory_space<vmem>>, vector<1x1x256xf32>
    %4 = vector.shape_cast %3 : vector<1x1x256xf32> to vector<1x256xf32>
    %5 = vector.broadcast %0 : f32 to vector<1x256xf32>
    %6 = arith.mulf %4, %5 : vector<1x256xf32>
    %c1_6 = arith.constant 1 : index
    %c0_7 = arith.constant 0 : index
    %c0_8 = arith.constant 0 : index
    %7 = vector.load %arg2[%c1_6, %c0_7, %c0_8] : memref<3x1x256xf32, #tpu.memory_space<vmem>>, vector<1x1x256xf32>
    %8 = vector.shape_cast %7 : vector<1x1x256xf32> to vector<1x256xf32>
    %9 = vector.broadcast %1 : f32 to vector<1x256xf32>
    %10 = arith.mulf %8, %9 : vector<1x256xf32>
    %11 = arith.addf %6, %10 : vector<1x256xf32>
    %c2_9 = arith.constant 2 : index
    %c0_10 = arith.constant 0 : index
    %c0_11 = arith.constant 0 : index
    %12 = vector.load %arg2[%c2_9, %c0_10, %c0_11] : memref<3x1x256xf32, #tpu.memory_space<vmem>>, vector<1x1x256xf32>
    %13 = vector.shape_cast %12 : vector<1x1x256xf32> to vector<1x256xf32>
    %14 = vector.broadcast %2 : f32 to vector<1x256xf32>
    %15 = arith.mulf %13, %14 : vector<1x256xf32>
    %16 = arith.addf %11, %15 : vector<1x256xf32>
    %c0_12 = arith.constant 0 : index
    %c0_13 = arith.constant 0 : index
    %17 = vector.load %arg3[%c0_12, %c0_13] : memref<1x256xf32, #tpu.memory_space<vmem>>, vector<1x256xf32>
    tpu.vector_store %arg3[%c0_12, %c0_13], %16 {strides = array<i32>} : memref<1x256xf32, #tpu.memory_space<vmem>>, vector<1x256xf32>,
    return
  }
  func.func @transform_0(%arg0: i32) -> (i32, i32) {
    %c0_i32 = arith.constant 0 : i32
    %c0_i32_0 = arith.constant 0 : i32
    %c0_i32_1 = arith.constant 0 : i32
    return %c0_i32, %c0_i32_0 : i32, i32
  }
  func.func @transform_1(%arg0: i32) -> (i32, i32, i32) {
    %c0_i32 = arith.constant 0 : i32
    %c0_i32_0 = arith.constant 0 : i32
    %c0_i32_1 = arith.constant 0 : i32
    return %c0_i32, %arg0, %c0_i32_0 : i32, i32, i32
  }
  func.func @transform_2(%arg0: i32) -> (i32, i32) {
    %c0_i32 = arith.constant 0 : i32
    %c0_i32_0 = arith.constant 0 : i32
    return %arg0, %c0_i32 : i32, i32
  }
}

</mosaic_0001>

<bundles_post_ra>
// kernel: tpu_custom_call.1
= control target key start
LH: loop header
LB: loop body
LE: loop exit
PB: predicated region body
PF: predicated region fallthrough
CT: control target
= control target key end

     0   :  { %7 = vsyncpa [#allocation5], 0  ;;  %s197_s0 = inlined_call_operand.hbm [shape: f32[1,3], index: 0, kind: input, shape index: {}]   ;;  %s198_s1 = inlined_call_operand.hbm [shape: f32[3,1,256], index: 1, kind: input, shape index: {}]   ;;  %s199_s2 = inlined_call_operand.hbm [shape: f32[1,256], index: 2, kind: output, shape index: {}]  }
   0x1   :  { %8 = vsyncpa [#allocation3], 0 }
   0x2   :  { %9 = vsyncpa [#allocation4], 0  ;;  %s81_s11 = scalar_lea.hbm %s197_s0, 16 }
   0x3   :  { %p82_p0 = scmp.ne.s32.totalorder %s197_s0, %s81_s11  ;;  %p85_p1 = scmp.lt.u32.totalorder %s81_s11, %s197_s0 }
   0x5   :  { %p87_p2 = pnand %p85_p1, %p82_p0 }
   0x7   :  { %90 = shalt.err (!%p87_p2)
}
   0x8   :  { %s141_s16 = smov [#allocation2]   ;;  %s142_s19 = smov [#allocation6]  }
   0x9   :  { %17 = dma.hbm_to_smem %s197_s0, 16, %s141_s16, [#allocation5]  }
   0xa   :  { %s23_s20 = sshll.u32 %s142_s19, 4  ;;  %s91_s23 = scalar_lea.hbm %s198_s1, 96  ;;  %s24_s20 = int_to_ptr.vmem [resolvable:$true] %s23_s20 }
   0xb   :  { %p92_p3 = scmp.ne.s32.totalorder %s198_s1, %s91_s23  ;;  %p95_p4 = scmp.lt.u32.totalorder %s91_s23, %s198_s1 }
   0xd   :  { %p97_p5 = pnand %p95_p4, %p92_p3 }
   0xf   :  { %100 = shalt.err (!%p97_p5)
}
  0x10   :  { %s101_s28 = scalar_lea.vmem %s24_s20, 96  ;;  %p106_p7 = scmp.lt.s32.totalorder %s24_s20, %s24_s20 }
  0x11   :  { %p102_p6 = scmp.ne.s32.totalorder %s24_s20, %s101_s28  ;;  %p107_p8 = scmp.lt.s32.totalorder %s101_s28, %s101_s28 }
  0x13   :  { %p108_p9 = por %p107_p8, %p106_p7 }
  0x15   :  { %p109_p10 = pnand %p108_p9, %p102_p6 }
  0x17   :  { %112 = shalt.err (!%p109_p10)
}
  0x18   :  { %s143_s0 = smov 32   ;;  %s144_s29 = smov 2  }
  0x19   :  { %29 = dma.hbm_to_vmem [thread:$0]  %s198_s1, 96, %s24_s20, [#allocation3], %s143_s0, %s143_s0, %s144_s29  }
  0x1a   :  { %135 = dma.done.wait [#allocation5], 16  }
  0x1b   :  { %136 = vsyncadd [#allocation5], 4294967280 }
  0x1c   :  { %137 = dma.done.wait [#allocation3], 96  }
  0x1d   :  { %138 = vsyncadd [#allocation3], 4294967200 }
  0x1e   :  { %36 = sfence }
  0x1f   :  { %s37_s4 = sld [smem:[#allocation2]]  ;;  %s74_s5 = sld [smem:[#allocation2 + $0x1]]  ;;  %v40_v0 = vld [vmem:[#allocation6] sm:$0x3]  ;;  %v44_v1 = vld [vmem:[#allocation6 + $0x2] sm:$0x3]  ;;  %v53_v5 = vlaneseq }
  0x20   :  { %s75_s6 = sld [smem:[#allocation2 + $0x2]]  ;;  %v49_v2 = vld [vmem:[#allocation6 + $0x4] sm:$0x3]  ;;  %s145_s7 = smov [#allocation7]  }
  0x21   :  { %s64_s1 = sshll.u32 %s145_s7, 4  ;;  %vm55_vm0 = vcmp.lt.s32.totalorder %v53_v5, 256  ;;  %s65_s1 = int_to_ptr.vmem [resolvable:$true] %s64_s1 }
  0x22   :  { %s113_s8 = scalar_lea.vmem %s65_s1, 32  ;;  %p118_p12 = scmp.lt.s32.totalorder %s65_s1, %s65_s1 }
  0x23   :  { %p114_p11 = scmp.ne.s32.totalorder %s65_s1, %s113_s8  ;;  %p119_p13 = scmp.lt.s32.totalorder %s113_s8, %s113_s8 }
  0x25   :  { %v41_v3 = vstv %s37_s4  ;;  %v45_v4 = vstv %s74_s5  ;;  %p120_p0 = por %p119_p13, %p118_p12 }
  0x26   :  { %v42_v6 = vmul.f32 %v41_v3, %v40_v0  ;;  %v46_v7 = vmul.f32 %v45_v4, %v44_v1  ;;  %v50_v8 = vstv %s75_s6 }
  0x27   :  { %v51_v9 = vmul.f32 %v50_v8, %v49_v2  ;;  %p121_p1 = pnand %p120_p0, %p114_p11 }
  0x28   :  { %v47_v10 = vadd.f32 %v46_v7, %v42_v6 }
  0x2a   :  { %v52_v11 = vadd.f32 %v51_v9, %v47_v10 }
  0x2c   :  { %57 = vst.msk [vmem:[#allocation7] sm:$0x3] %vm55_vm0, %v52_v11 }
  0x2d   :  { %124 = shalt.err (!%p121_p1)
}
  0x2e   :  { %s125_s11 = scalar_lea.hbm %s199_s2, 32 }
  0x2f   :  { %p126_p2 = scmp.ne.s32.totalorder %s199_s2, %s125_s11  ;;  %p129_p3 = scmp.lt.u32.totalorder %s125_s11, %s199_s2 }
  0x31   :  { %p131_p4 = pnand %p129_p3, %p126_p2 }
  0x33   :  { %134 = shalt.err (!%p131_p4)
}
  0x34   :  { %67 = dma.vmem_to_hbm [thread:$0]  %s65_s1, 32, %s199_s2, [#allocation4]  }
  0x35   :  { %139 = dma.done.wait [#allocation4], 32  }
  0x36   :  { %140 = vsyncadd [#allocation4], 4294967264 }
  0x37   :  { %71 = vsyncpa [#allocation3], 1 }
  0x38   :  { %72 = vsyncpa [#allocation4], 1 }
  0x39   :  { %73 = vsyncpa [#allocation5], 1 }

</bundles_post_ra>
